<compile_context>
chip_gen: v7x
topology: tpu7x:2x2x1
jax: 0.10.0
libtpu: 0.0.40
codegen_flags: <defaults>
</compile_context>

<pallas_src>
import jax
import jax.numpy as jnp
from jax.experimental import pallas as pl
from jax.experimental.pallas import tpu as pltpu


# ---------------------------------------------------------------------------
# Fused per-stage kernel: GEMM (conv-as-im2col, BN scale pre-folded into W)
#                         + per-channel shift + ReLU + pooled-path broadcast add
# ---------------------------------------------------------------------------
def _stage_kernel(patch_ref, w_ref, shift_ref, pooladd_ref, out_ref):
    # patch_ref:   (TM, K)      im2col rows for this tile (K = 9*Cin), bf16/f32
    # w_ref:       (K, Cout)    resident conv weights with BN scale folded in
    # shift_ref:   (1, Cout)    folded shift: beta + scale*(conv_bias - mean)
    # pooladd_ref: (TM, 1)      precomputed pooled-path value for each row
    # out_ref:     (TM, Cout)   stage output = relu(conv_bn) + pooled
    y = jnp.dot(patch_ref[...], w_ref[...],
                preferred_element_type=jnp.float32)        # MXU, f32 accumulate
    y = y + shift_ref[...]                                 # folded bias/BN shift
    y = jnp.maximum(y, 0.0)                                # ReLU
    out_ref[...] = (y + pooladd_ref[...]).astype(out_ref.dtype)  # + pooled path


def _pick_row_tile(m):
    """Row-tile choice per the perf review: never split small M."""
    if m <= 512:                 # grid=(1,): serial loop on v5e/v6e; splitting
        return m                 # tiny M just adds per-step overhead.
    for t in (512, 1024, 256):   # measured HBM efficiency: 512->85%, 1024->86%
        if m % t == 0:
            return t
    for t in range(512, 255, -8):  # largest mult-of-8 divisor >= 256
        if m % t == 0:
            return t
    return m


def _fused_stage(patches, w_fold, shift, pool_add):
    m, k = patches.shape
    c_out = w_fold.shape[1]
    tm = _pick_row_tile(m)
    grid = (m // tm,)

    in_sz = patches.dtype.itemsize
    w_sz = w_fold.dtype.itemsize
    cost = pl.CostEstimate(
        flops=2 * m * k * c_out,
        transcendentals=0,
        bytes_accessed=(patches.size * in_sz + w_fold.size * w_sz
                        + shift.size * 4 + pool_add.size * 4 + m * c_out * 4),
    )

    # Explicit VMEM budget (double-buffered tiles + resident weights), with
    # generous headroom, capped well under v7x's 64 MiB physical VMEM.
    vmem_need = (2 * (tm * k * in_sz + tm * 4 + tm * c_out * 4)
                 + 2 * (k * c_out * w_sz + c_out * 4))
    vmem_limit = int(min(48 * 2**20, max(32 * 2**20, 2 * vmem_need + (8 << 20))))

    return pl.pallas_call(
        _stage_kernel,
        out_shape=jax.ShapeDtypeStruct((m, c_out), jnp.float32),
        grid_spec=pltpu.PrefetchScalarGridSpec(
            num_scalar_prefetch=0,
            grid=grid,
            in_specs=[
                pl.BlockSpec((tm, k), lambda i: (i, 0)),      # patches (tiled)
                pl.BlockSpec((k, c_out), lambda i: (0, 0)),   # weights (resident)
                pl.BlockSpec((1, c_out), lambda i: (0, 0)),   # shift (resident)
                pl.BlockSpec((tm, 1), lambda i: (i, 0)),      # pooled add term
            ],
            out_specs=pl.BlockSpec((tm, c_out), lambda i: (i, 0)),
        ),
        compiler_params=pltpu.CompilerParams(
            dimension_semantics=("parallel",),   # row axis shardable across TCs
            vmem_limit_bytes=vmem_limit,
        ),
        cost_estimate=cost,
    )(patches, w_fold, shift, pool_add)


# ---------------------------------------------------------------------------
# Wrapper-side layout plumbing (padding / strided patch extraction / reshapes)
# ---------------------------------------------------------------------------
def _im2col_s2(x_nhwc, dtype):
    """3x3, stride-2, pad-1 patches. (N,H,W,C) -> (N*OH*OW, 9*C) in `dtype`."""
    n, h, w, c = x_nhwc.shape
    oh, ow = h // 2, w // 2
    xp = jnp.pad(x_nhwc.astype(dtype), ((0, 0), (1, 1), (1, 1), (0, 0)))
    cols = [xp[:, kh:kh + 2 * oh:2, kw:kw + 2 * ow:2, :]
            for kh in range(3) for kw in range(3)]
    patches = jnp.concatenate(cols, axis=-1)              # (N, OH, OW, 9*C)
    return patches.reshape(n * oh * ow, 9 * c), oh, ow


def _pool_pyramid(p_nhw, n_stages):
    """1-channel pooled path: successive 2x2 max-pools, flattened to (M_i,1)."""
    terms = []
    p = p_nhw
    for _ in range(n_stages):
        n, h, w = p.shape
        p = p.reshape(n, h // 2, 2, w // 2, 2).max(axis=(2, 4))
        terms.append(p.reshape(-1, 1).astype(jnp.float32))
    return terms


def two_path_encoder(x_nchw, params, compute_dtype=jnp.bfloat16):
    """Forward pass.  x_nchw: (N, 1, H, W); params: list of per-stage tuples
    (w_hwio (3,3,Cin,Cout), conv_bias, gamma, beta, running_mean, running_var).
    """
    n, cin0, h, w = x_nchw.shape
    n_stages = len(params)
    assert cin0 == 1, "model is defined for a single input channel"
    assert h % (2 ** n_stages) == 0 and w % (2 ** n_stages) == 0, (
        "spatial dims must be divisible by 2**n_stages (even at every stage)")

    x = jnp.transpose(x_nchw, (0, 2, 3, 1))              # NHWC, channels->lanes
    pool_terms = _pool_pyramid(x[..., 0], n_stages)      # conv-independent path
    eps = 1e-5

    for stage, (w_hwio, conv_b, gamma, beta, mean, var) in enumerate(params):
        c_in, c_out = w_hwio.shape[2], w_hwio.shape[3]
        scale = gamma * jax.lax.rsqrt(var + eps)                       # (Cout,)
        w_fold = (w_hwio * scale).reshape(9 * c_in, c_out).astype(compute_dtype)
        shift = (beta + scale * (conv_b - mean)).reshape(1, c_out)
        shift = shift.astype(jnp.float32)
        patches, oh, ow = _im2col_s2(x, compute_dtype)
        y = _fused_stage(patches, w_fold, shift, pool_terms[stage])
        x = y.reshape(n, oh, ow, c_out)                  # f32 stage output

    return jnp.transpose(x, (0, 3, 1, 2))                # back to NCHW


# ---------------------------------------------------------------------------
# Self-test
# ---------------------------------------------------------------------------
if __name__ == "__main__":
    N, H, W = 2, 32, 32                                  # 5 stride-2 stages -> 1x1
    chans_in = [1, 32, 64, 128, 256]
    chans_out = [32, 64, 128, 256, 512]

    key = jax.random.PRNGKey(0)
    keys = jax.random.split(key, 1 + 6 * len(chans_in))
    x = jax.random.normal(keys[0], (N, 1, H, W), dtype=jnp.float32)

    params = []
    ki = 1
    for cin, cout in zip(chans_in, chans_out):
        kw_, kb_, kg_, kbt_, km_, kv_ = keys[ki:ki + 6]
        ki += 6
        bound = 1.0 / ((cin * 9) ** 0.5)
        wgt = jax.random.uniform(kw_, (3, 3, cin, cout), minval=-bound,
                                 maxval=bound, dtype=jnp.float32)
        b = jax.random.uniform(kb_, (cout,), minval=-bound, maxval=bound,
                               dtype=jnp.float32)
        gamma = 1.0 + 0.1 * jax.random.normal(kg_, (cout,), dtype=jnp.float32)
        beta = 0.1 * jax.random.normal(kbt_, (cout,), dtype=jnp.float32)
        mean = 0.1 * jax.random.normal(km_, (cout,), dtype=jnp.float32)
        var = jnp.abs(1.0 + 0.1 * jax.random.normal(kv_, (cout,),
                                                    dtype=jnp.float32))
        params.append((wgt, b, gamma, beta, mean, var))

    # Production (bf16-fed MXU) path and an f32 verification path.
    out_bf16 = jax.block_until_ready(two_path_encoder(x, params))
    out_f32 = jax.block_until_ready(
        two_path_encoder(x, params, compute_dtype=jnp.float32))

    # Independent plain-JAX reference (eval-mode BatchNorm, explicit conv, f32).
    def ref_forward(x_nchw, ps):
        cur = jnp.transpose(x_nchw, (0, 2, 3, 1))        # NHWC
        pooled = cur                                     # (N, H, W, 1)
        for (w_hwio, b, gamma, beta, mean, var) in ps:
            conv = jax.lax.conv_general_dilated(
                cur, w_hwio, window_strides=(2, 2), padding=((1, 1), (1, 1)),
                dimension_numbers=("NHWC", "HWIO", "NHWC"),
                precision=jax.lax.Precision.HIGHEST) + b
            bn = (conv - mean) / jnp.sqrt(var + 1e-5) * gamma + beta
            act = jnp.maximum(bn, 0.0)
            np_, hp_, wp_, cp_ = pooled.shape
            pooled = pooled.reshape(np_, hp_ // 2, 2, wp_ // 2, 2,
                                    cp_).max(axis=(2, 4))
            cur = act + pooled                           # broadcast over channels
        return jnp.transpose(cur, (0, 3, 1, 2))

    ref = ref_forward(x, params)
    assert out_bf16.shape == (N, 512, 1, 1), out_bf16.shape
    assert out_f32.shape == (N, 512, 1, 1), out_f32.shape

    # Tight semantic check (f32 kernel path vs f32 reference).
    err_f32 = float(jnp.max(jnp.abs(out_f32 - ref)))
    assert jnp.allclose(out_f32, ref, atol=1e-3, rtol=1e-3), (
        "f32-path mismatch vs reference: max abs diff = %g" % err_f32)

    # Loose check on the bf16-fed production path (f32 accumulation, bf16
    # operand rounding only).
    err_bf16 = float(jnp.max(jnp.abs(out_bf16 - ref)))
    assert jnp.allclose(out_bf16, ref, atol=0.2, rtol=0.1), (
        "bf16-path mismatch vs reference: max abs diff = %g" % err_bf16)

    print("KERNEL_OK")
</pallas_src>

<mosaic_0001>
module attributes {stable_mosaic.version = 11 : i64} {
  func.func @_stage_kernel(%arg0: i32, %arg1: memref<512x9xbf16, #tpu.memory_space<vmem>>, %arg2: memref<9x32xbf16, #tpu.memory_space<vmem>>, %arg3: memref<1x32xf32, #tpu.memory_space<vmem>>, %arg4: memref<512x1xf32, #tpu.memory_space<vmem>>, %arg5: memref<512x32xf32, #tpu.memory_space<vmem>>) attributes {dimension_semantics = [#tpu.dimension_semantics<parallel>], iteration_bounds = array<i64: 1>, scalar_prefetch = 0 : i64, scratch_operands = 0 : i64, tpu.core_type = #tpu.core_type<tc>, window_params = [{transform_indices = @transform_0, window_bounds = array<i64: 512, 9>}, {pipeline_mode = #tpu.pipeline_mode<synchronous>, transform_indices = @transform_1, window_bounds = array<i64: 9, 32>}, {pipeline_mode = #tpu.pipeline_mode<synchronous>, transform_indices = @transform_2, window_bounds = array<i64: 1, 32>}, {transform_indices = @transform_3, window_bounds = array<i64: 512, 1>}, {transform_indices = @transform_4, window_bounds = array<i64: 512, 32>}]} {
    %c0 = arith.constant 0 : index
    %c0_0 = arith.constant 0 : index
    %0 = vector.load %arg1[%c0, %c0_0] : memref<512x9xbf16, #tpu.memory_space<vmem>>, vector<512x9xbf16>
    %c0_1 = arith.constant 0 : index
    %c0_2 = arith.constant 0 : index
    %1 = vector.load %arg2[%c0_1, %c0_2] : memref<9x32xbf16, #tpu.memory_space<vmem>>, vector<9x32xbf16>
    %cst = arith.constant dense<0.000000e+00> : vector<512x32xf32>
    %2 = tpu.matmul %0, %1, %cst {dimension_numbers = #tpu.dot_dimension_numbers<[1], [0], [0], [1], [0, 0, 1, 1], [], []>} : vector<512x9xbf16>, vector<9x32xbf16>, vector<512x32xf32> -> vector<512x32xf32>
    %c0_3 = arith.constant 0 : index
    %c0_4 = arith.constant 0 : index
    %3 = vector.load %arg3[%c0_3, %c0_4] : memref<1x32xf32, #tpu.memory_space<vmem>>, vector<1x32xf32>
    %4 = vector.broadcast %3 : vector<1x32xf32> to vector<512x32xf32>
    %5 = arith.addf %2, %4 : vector<512x32xf32>
    %cst_5 = arith.constant 0.000000e+00 : f32
    %6 = vector.broadcast %cst_5 : f32 to vector<512x32xf32>
    %7 = arith.maximumf %5, %6 : vector<512x32xf32>
    %c0_6 = arith.constant 0 : index
    %c0_7 = arith.constant 0 : index
    %8 = vector.load %arg4[%c0_6, %c0_7] : memref<512x1xf32, #tpu.memory_space<vmem>>, vector<512x1xf32>
    %9 = vector.broadcast %8 : vector<512x1xf32> to vector<512x32xf32>
    %10 = arith.addf %7, %9 : vector<512x32xf32>
    %c0_8 = arith.constant 0 : index
    %c0_9 = arith.constant 0 : index
    %11 = vector.load %arg5[%c0_8, %c0_9] : memref<512x32xf32, #tpu.memory_space<vmem>>, vector<512x32xf32>
    tpu.vector_store %arg5[%c0_8, %c0_9], %10 {strides = array<i32>} : memref<512x32xf32, #tpu.memory_space<vmem>>, vector<512x32xf32>,
    return
  }
  func.func @transform_0(%arg0: i32) -> (i32, i32) {
    %c0_i32 = arith.constant 0 : i32
    %c0_i32_0 = arith.constant 0 : i32
    return %arg0, %c0_i32 : i32, i32
  }
  func.func @transform_1(%arg0: i32) -> (i32, i32) {
    %c0_i32 = arith.constant 0 : i32
    %c0_i32_0 = arith.constant 0 : i32
    %c0_i32_1 = arith.constant 0 : i32
    return %c0_i32, %c0_i32_0 : i32, i32
  }
  func.func @transform_2(%arg0: i32) -> (i32, i32) {
    %c0_i32 = arith.constant 0 : i32
    %c0_i32_0 = arith.constant 0 : i32
    %c0_i32_1 = arith.constant 0 : i32
    return %c0_i32, %c0_i32_0 : i32, i32
  }
  func.func @transform_3(%arg0: i32) -> (i32, i32) {
    %c0_i32 = arith.constant 0 : i32
    %c0_i32_0 = arith.constant 0 : i32
    return %arg0, %c0_i32 : i32, i32
  }
  func.func @transform_4(%arg0: i32) -> (i32, i32) {
    %c0_i32 = arith.constant 0 : i32
    %c0_i32_0 = arith.constant 0 : i32
    return %arg0, %c0_i32 : i32, i32
  }
}

</mosaic_0001>

<bundles_post_ra>
// kernel: tpu_custom_call.1
= control target key start
LH: loop header
LB: loop body
LE: loop exit
PB: predicated region body
PF: predicated region fallthrough
CT: control target
= control target key end

     0   :  { %vm353_vm0 = vcmask 1043456   ;;  %vm354_vm1 = vcmask 1044480   ;;  %v1434_v0 = vmov 0   ;;  %v1435_v4 = vmov 65535   ;;  %s2271_s3 = inlined_call_operand.vmem [shape: f32[512,1], index: 3, kind: input, shape index: {}]   ;;  %s2272_s1 = inlined_call_operand.vmem [shape: bf16[9,32], index: 1, kind: input, shape index: {}]   ;;  %s2273_s0 = inlined_call_operand.vmem [shape: bf16[512,9], index: 0, kind: input, shape index: {}]   ;;  %s2274_s2 = inlined_call_operand.vmem [shape: f32[1,32], index: 2, kind: input, shape index: {}]   ;;  %s2275_s4 = inlined_call_operand.vmem [shape: f32[512,32], index: 4, kind: output, shape index: {}]  }
   0x1   :  { %1400 = vset.pattern.permute.xlu1 %v1434_v0  ;;  %1399 = vset.pattern.permute.xlu0 %v1434_v0  ;;  %v715_v1 = vld [vmem:[%s2271_s3 + $0x10] sm:$0xff]  ;;  %v713_v2 = vld [vmem:[%s2271_s3] sm:$0xff]  ;;  %v716_v3 = vld [vmem:[%s2271_s3 + $0x18] sm:$0xff]  ;;  %v355_v5 = vsel %vm353_vm0, 4294967295, %v1435_v4  ;;  %vm256_vm2 = vcmask 72704   ;;  %vm1161_vm3 = vcmask 261120  }
   0x2   :  { %789 = vperm.xlu1 %1400, %v715_v1   ;;  %779 = vperm.xlu0 %1399, %v713_v2   ;;  %v714_v6 = vld [vmem:[%s2271_s3 + $0x8] sm:$0xff]  ;;  %v356_v7 = vsel %vm354_vm1, %v355_v5, 0  ;;  %v1401_v8 = vld [vmem:[%s2272_s1] sm:$0x1f]   ;;  %v1406_v16 = vld [vmem:[%s2273_s0 + $0x10] sm:$0xff]  }
   0x3   :  { %v1402_v9 = vld [vmem:[%s2273_s0] sm:$0xff]   ;;  %v358_v10 = vand.u32 %v1401_v8, %v356_v7  ;;  %v718_v12 = vld [vmem:[%s2271_s3 + $0x28] sm:$0xff]  ;;  %v720_v17 = vld [vmem:[%s2271_s3 + $0x38] sm:$0xff] }
   0x4   :  { %v1403_v11 = vld [vmem:[%s2273_s0 + $0x80] sm:$0xff]   ;;  %v1404_v14 = vld [vmem:[%s2273_s0 + $0x8] sm:$0xff]   ;;  %1331 = vmatprep.mubr.msk.bf16.mxu0 %vm256_vm2, %v1402_v9  ;;  %v1407_v18 = vld [vmem:[%s2273_s0 + $0x90] sm:$0xff]  }
   0x5   :  { %v717_v13 = vld [vmem:[%s2271_s3 + $0x20] sm:$0xff]  ;;  %1329 = vmatprep.subr.bf16.mxu0 %v358_v10  ;;  %1395 = vmatprep.subr.bf16.mxu1 %v358_v10  ;;  %v1405_v15 = vld [vmem:[%s2273_s0 + $0x88] sm:$0xff]   ;;  %v719_v19 = vld [vmem:[%s2271_s3 + $0x30] sm:$0xff] }
   0x6   :  { %794 = vperm.xlu1 %1400, %v716_v3   ;;  %784 = vperm.xlu0 %1399, %v714_v6   ;;  %v722_v20 = vld [vmem:[%s2271_s3 + $0x48] sm:$0xff]  ;;  %v721_v21 = vld [vmem:[%s2271_s3 + $0x40] sm:$0xff]  ;;  %v1408_v22 = vld [vmem:[%s2273_s0 + $0x18] sm:$0xff]  }
   0x7   :  { %1330 = vmatpush3.bf16.msra.mxu0 %v358_v10  ;;  %1396 = vmatpush3.bf16.msra.mxu1 %v358_v10  ;;  %v1409_v23 = vld [vmem:[%s2273_s0 + $0x98] sm:$0xff]   ;;  %v1410_v24 = vld [vmem:[%s2273_s0 + $0x20] sm:$0xff]   ;;  %v723_v27 = vld [vmem:[%s2271_s3 + $0x50] sm:$0xff] }
   0x8   :  { %1363 = vmatprep.mubr.msk.bf16.mxu1 %vm256_vm2, %v1403_v11  ;;  %v1411_v25 = vld [vmem:[%s2273_s0 + $0xa0] sm:$0xff]   ;;  %v724_v26 = vld [vmem:[%s2271_s3 + $0x58] sm:$0xff]  ;;  %v726_v28 = vld [vmem:[%s2271_s3 + $0x68] sm:$0xff] }
   0x9   :  { %v725_v29 = vld [vmem:[%s2271_s3 + $0x60] sm:$0xff]  ;;  %v1412_v30 = vld [vmem:[%s2273_s0 + $0x28] sm:$0xff]   ;;  %v1414_v32 = vld [vmem:[%s2273_s0 + $0x30] sm:$0xff]  }
   0xa   :  { %804 = vperm.xlu1 %1400, %v718_v12   ;;  %799 = vperm.xlu0 %1399, %v717_v13   ;;  %v1413_v31 = vld [vmem:[%s2273_s0 + $0xa8] sm:$0xff]   ;;  %v1415_v33 = vld [vmem:[%s2273_s0 + $0xb0] sm:$0xff]   ;;  %v728_v34 = vld [vmem:[%s2271_s3 + $0x78] sm:$0xff] }
   0xb   :  { %1332 = vmatmul.mubr.msk.bf16.vlgmr.msra.gmra.mrb[0].mxu0 %vm256_vm2, %v1404_v14  ;;  %1364 = vmatmul.mubr.msk.bf16.vlgmr.msra.gmra.mrb[0].mxu1 %vm256_vm2, %v1405_v15  ;;  %v727_v35 = vld [vmem:[%s2271_s3 + $0x70] sm:$0xff]  ;;  %v730_v36 = vld [vmem:[%s2271_s3 + $0x88] sm:$0xff]  ;;  %v729_v37 = vld [vmem:[%s2271_s3 + $0x80] sm:$0xff] }
   0xc   :  { %1335 = vmatprep.mubr.msk.bf16.mxu0 %vm256_vm2, %v1406_v16  ;;  %1367 = vmatprep.mubr.msk.bf16.mxu1 %vm256_vm2, %v1407_v18  ;;  %v1416_v38 = vld [vmem:[%s2273_s0 + $0x38] sm:$0xff]   ;;  %v1418_v40 = vld [vmem:[%s2273_s0 + $0x40] sm:$0xff]   ;;  %v731_v43 = vld [vmem:[%s2271_s3 + $0x90] sm:$0xff] }
   0xd   :  { %v1417_v39 = vld [vmem:[%s2273_s0 + $0xb8] sm:$0xff]   ;;  %v1419_v41 = vld [vmem:[%s2273_s0 + $0xc0] sm:$0xff]   ;;  %v734_v44 = vld [vmem:[%s2271_s3 + $0xa8] sm:$0xff] }
   0xe   :  { %814 = vperm.xlu1 %1400, %v720_v17   ;;  %809 = vperm.xlu0 %1399, %v719_v19   ;;  %v732_v42 = vld [vmem:[%s2271_s3 + $0x98] sm:$0xff]  ;;  %v733_v45 = vld [vmem:[%s2271_s3 + $0xa0] sm:$0xff]  ;;  %v1420_v46 = vld [vmem:[%s2273_s0 + $0x48] sm:$0xff]  }
   0xf   :  { %v1421_v47 = vld [vmem:[%s2273_s0 + $0xc8] sm:$0xff]   ;;  %v1422_v48 = vld [vmem:[%s2273_s0 + $0x50] sm:$0xff]   ;;  %v736_v50 = vld [vmem:[%s2271_s3 + $0xb8] sm:$0xff] }
  0x10   :  { %v1423_v49 = vld [vmem:[%s2273_s0 + $0xd0] sm:$0xff]   ;;  %v738_v52 = vld [vmem:[%s2271_s3 + $0xc8] sm:$0xff]  ;;  %v737_v53 = vld [vmem:[%s2271_s3 + $0xc0] sm:$0xff] }
  0x11   :  { %v735_v51 = vld [vmem:[%s2271_s3 + $0xb0] sm:$0xff]  ;;  %v1424_v54 = vld [vmem:[%s2273_s0 + $0x58] sm:$0xff]   ;;  %v1426_v56 = vld [vmem:[%s2273_s0 + $0x60] sm:$0xff]  }
  0x12   :  { %824 = vperm.xlu1 %1400, %v722_v20   ;;  %819 = vperm.xlu0 %1399, %v721_v21   ;;  %v1425_v55 = vld [vmem:[%s2273_s0 + $0xd8] sm:$0xff]   ;;  %v1427_v57 = vld [vmem:[%s2273_s0 + $0xe0] sm:$0xff]   ;;  %v739_v59 = vld [vmem:[%s2271_s3 + $0xd0] sm:$0xff] }
  0x13   :  { %1336 = vmatmul.mubr.msk.bf16.gmra.mrb[4].mxu0 %vm256_vm2, %v1408_v22  ;;  %1368 = vmatmul.mubr.msk.bf16.gmra.mrb[4].mxu1 %vm256_vm2, %v1409_v23  ;;  %v740_v58 = vld [vmem:[%s2271_s3 + $0xd8] sm:$0xff]  ;;  %v742_v60 = vld [vmem:[%s2271_s3 + $0xe8] sm:$0xff]  ;;  %v741_v61 = vld [vmem:[%s2271_s3 + $0xe0] sm:$0xff] }
  0x14   :  { %1339 = vmatprep.mubr.msk.bf16.mxu0 %vm256_vm2, %v1410_v24  ;;  %1371 = vmatprep.mubr.msk.bf16.mxu1 %vm256_vm2, %v1411_v25  ;;  %v1428_v62 = vld [vmem:[%s2273_s0 + $0x68] sm:$0xff]   ;;  %v1430_v0 = vld [vmem:[%s2273_s0 + $0x70] sm:$0xff]   ;;  %v744_v2 = vld [vmem:[%s2271_s3 + $0xf8] sm:$0xff] }
  0x15   :  { %v1429_v63 = vld [vmem:[%s2273_s0 + $0xe8] sm:$0xff]   ;;  %v1431_v1 = vld [vmem:[%s2273_s0 + $0xf0] sm:$0xff]   ;;  %v745_v5 = vld [vmem:[%s2271_s3 + $0x100] sm:$0xff] }
  0x16   :  { %834 = vperm.xlu1 %1400, %v724_v26   ;;  %829 = vperm.xlu0 %1399, %v723_v27   ;;  %v743_v3 = vld [vmem:[%s2271_s3 + $0xf0] sm:$0xff]  ;;  %v746_v4 = vld [vmem:[%s2271_s3 + $0x108] sm:$0xff]  ;;  %v1432_v6 = vld [vmem:[%s2273_s0 + $0x78] sm:$0xff]  }
  0x17   :  { %v1433_v7 = vld [vmem:[%s2273_s0 + $0xf8] sm:$0xff]   ;;  %v747_v9 = vld [vmem:[%s2271_s3 + $0x110] sm:$0xff]  ;;  %v750_v10 = vld [vmem:[%s2271_s3 + $0x128] sm:$0xff] }
  0x18   :  { %v748_v8 = vld [vmem:[%s2271_s3 + $0x118] sm:$0xff]  ;;  %v749_v11 = vld [vmem:[%s2271_s3 + $0x120] sm:$0xff]  ;;  %v751_v13 = vld [vmem:[%s2271_s3 + $0x130] sm:$0xff] }
  0x19   :  { %v752_v12 = vld [vmem:[%s2271_s3 + $0x138] sm:$0xff]  ;;  %v754_v14 = vld [vmem:[%s2271_s3 + $0x148] sm:$0xff]  ;;  %v753_v15 = vld [vmem:[%s2271_s3 + $0x140] sm:$0xff] }
  0x1a   :  { %844 = vperm.xlu1 %1400, %v726_v28   ;;  %839 = vperm.xlu0 %1399, %v725_v29   ;;  %v756_v16 = vld [vmem:[%s2271_s3 + $0x158] sm:$0xff]  ;;  %v755_v17 = vld [vmem:[%s2271_s3 + $0x150] sm:$0xff]  ;;  %v758_v18 = vld [vmem:[%s2271_s3 + $0x168] sm:$0xff] }
  0x1b   :  { %1340 = vmatmul.mubr.msk.bf16.gmra.mrb[8].mxu0 %vm256_vm2, %v1412_v30  ;;  %1372 = vmatmul.mubr.msk.bf16.gmra.mrb[8].mxu1 %vm256_vm2, %v1413_v31  ;;  %v757_v19 = vld [vmem:[%s2271_s3 + $0x160] sm:$0xff]  ;;  %v760_v20 = vld [vmem:[%s2271_s3 + $0x178] sm:$0xff]  ;;  %v759_v21 = vld [vmem:[%s2271_s3 + $0x170] sm:$0xff] }
  0x1c   :  { %1343 = vmatprep.mubr.msk.bf16.mxu0 %vm256_vm2, %v1414_v32  ;;  %1375 = vmatprep.mubr.msk.bf16.mxu1 %vm256_vm2, %v1415_v33  ;;  %v762_v22 = vld [vmem:[%s2271_s3 + $0x188] sm:$0xff]  ;;  %v761_v23 = vld [vmem:[%s2271_s3 + $0x180] sm:$0xff]  ;;  %v764_v24 = vld [vmem:[%s2271_s3 + $0x198] sm:$0xff] }
  0x1d   :  { %v763_v25 = vld [vmem:[%s2271_s3 + $0x190] sm:$0xff]  ;;  %v766_v26 = vld [vmem:[%s2271_s3 + $0x1a8] sm:$0xff]  ;;  %v765_v27 = vld [vmem:[%s2271_s3 + $0x1a0] sm:$0xff] }
  0x1e   :  { %854 = vperm.xlu1 %1400, %v728_v34   ;;  %849 = vperm.xlu0 %1399, %v727_v35   ;;  %v768_v28 = vld [vmem:[%s2271_s3 + $0x1b8] sm:$0xff]  ;;  %v767_v29 = vld [vmem:[%s2271_s3 + $0x1b0] sm:$0xff]  ;;  %v770_v30 = vld [vmem:[%s2271_s3 + $0x1c8] sm:$0xff] }
  0x1f   :  { %v769_v31 = vld [vmem:[%s2271_s3 + $0x1c0] sm:$0xff]  ;;  %v772_v32 = vld [vmem:[%s2271_s3 + $0x1d8] sm:$0xff]  ;;  %v771_v33 = vld [vmem:[%s2271_s3 + $0x1d0] sm:$0xff] }
  0x20   :  { %v774_v34 = vld [vmem:[%s2271_s3 + $0x1e8] sm:$0xff]  ;;  %v773_v35 = vld [vmem:[%s2271_s3 + $0x1e0] sm:$0xff] }
  0x22   :  { %864 = vperm.xlu1 %1400, %v730_v36   ;;  %859 = vperm.xlu0 %1399, %v729_v37   ;;  %v776_v36 = vld [vmem:[%s2271_s3 + $0x1f8] sm:$0xff]  ;;  %v775_v37 = vld [vmem:[%s2271_s3 + $0x1f0] sm:$0xff] }
  0x23   :  { %1344 = vmatmul.mubr.msk.bf16.gmra.mrb[12].mxu0 %vm256_vm2, %v1416_v38  ;;  %1376 = vmatmul.mubr.msk.bf16.gmra.mrb[12].mxu1 %vm256_vm2, %v1417_v39 }
  0x24   :  { %1347 = vmatprep.mubr.msk.bf16.mxu0 %vm256_vm2, %v1418_v40  ;;  %1379 = vmatprep.mubr.msk.bf16.mxu1 %vm256_vm2, %v1419_v41 }
  0x26   :  { %874 = vperm.xlu1 %1400, %v732_v42   ;;  %869 = vperm.xlu0 %1399, %v731_v43  }
  0x2a   :  { %884 = vperm.xlu1 %1400, %v734_v44   ;;  %879 = vperm.xlu0 %1399, %v733_v45  }
  0x2b   :  { %1348 = vmatmul.mubr.msk.bf16.gmra.mrb[16].mxu0 %vm256_vm2, %v1420_v46  ;;  %1380 = vmatmul.mubr.msk.bf16.gmra.mrb[16].mxu1 %vm256_vm2, %v1421_v47 }
  0x2c   :  { %1351 = vmatprep.mubr.msk.bf16.mxu0 %vm256_vm2, %v1422_v48  ;;  %1383 = vmatprep.mubr.msk.bf16.mxu1 %vm256_vm2, %v1423_v49 }
  0x2e   :  { %894 = vperm.xlu1 %1400, %v736_v50   ;;  %889 = vperm.xlu0 %1399, %v735_v51  }
  0x32   :  { %904 = vperm.xlu1 %1400, %v738_v52   ;;  %899 = vperm.xlu0 %1399, %v737_v53  }
  0x33   :  { %1352 = vmatmul.mubr.msk.bf16.gmra.mrb[20].mxu0 %vm256_vm2, %v1424_v54  ;;  %1384 = vmatmul.mubr.msk.bf16.gmra.mrb[20].mxu1 %vm256_vm2, %v1425_v55 }
  0x34   :  { %1355 = vmatprep.mubr.msk.bf16.mxu0 %vm256_vm2, %v1426_v56  ;;  %1387 = vmatprep.mubr.msk.bf16.mxu1 %vm256_vm2, %v1427_v57 }
  0x36   :  { %914 = vperm.xlu1 %1400, %v740_v58   ;;  %909 = vperm.xlu0 %1399, %v739_v59  }
  0x3a   :  { %924 = vperm.xlu1 %1400, %v742_v60   ;;  %919 = vperm.xlu0 %1399, %v741_v61  }
  0x3b   :  { %1356 = vmatmul.mubr.msk.bf16.gmra.mrb[24].mxu0 %vm256_vm2, %v1428_v62  ;;  %1388 = vmatmul.mubr.msk.bf16.gmra.mrb[24].mxu1 %vm256_vm2, %v1429_v63 }
  0x3c   :  { %1359 = vmatprep.mubr.msk.bf16.mxu0 %vm256_vm2, %v1430_v0  ;;  %1391 = vmatprep.mubr.msk.bf16.mxu1 %vm256_vm2, %v1431_v1 }
  0x3e   :  { %934 = vperm.xlu1 %1400, %v744_v2   ;;  %929 = vperm.xlu0 %1399, %v743_v3  }
  0x42   :  { %944 = vperm.xlu1 %1400, %v746_v4   ;;  %939 = vperm.xlu0 %1399, %v745_v5  }
  0x43   :  { %1360 = vmatmul.mubr.msk.bf16.gmra.mrb[28].mxu0 %vm256_vm2, %v1432_v6  ;;  %1392 = vmatmul.mubr.msk.bf16.gmra.mrb[28].mxu1 %vm256_vm2, %v1433_v7 }
  0x46   :  { %954 = vperm.xlu1 %1400, %v748_v8   ;;  %949 = vperm.xlu0 %1399, %v747_v9  }
  0x4a   :  { %964 = vperm.xlu1 %1400, %v750_v10   ;;  %959 = vperm.xlu0 %1399, %v749_v11  }
  0x4e   :  { %974 = vperm.xlu1 %1400, %v752_v12   ;;  %969 = vperm.xlu0 %1399, %v751_v13  }
  0x52   :  { %984 = vperm.xlu1 %1400, %v754_v14   ;;  %979 = vperm.xlu0 %1399, %v753_v15  }
  0x56   :  { %994 = vperm.xlu1 %1400, %v756_v16   ;;  %989 = vperm.xlu0 %1399, %v755_v17  }
  0x5a   :  { %1004 = vperm.xlu1 %1400, %v758_v18   ;;  %999 = vperm.xlu0 %1399, %v757_v19  }
  0x5e   :  { %1014 = vperm.xlu1 %1400, %v760_v20   ;;  %1009 = vperm.xlu0 %1399, %v759_v21   ;;  %v1871_v20 = vld [vmem:[%s2274_s2] ss:$0 sm:$0xff] }
  0x62   :  { %1024 = vperm.xlu1 %1400, %v762_v22   ;;  %1019 = vperm.xlu0 %1399, %v761_v23  }
  0x66   :  { %1034 = vperm.xlu1 %1400, %v764_v24   ;;  %1029 = vperm.xlu0 %1399, %v763_v25  }
  0x6a   :  { %1044 = vperm.xlu1 %1400, %v766_v26   ;;  %1039 = vperm.xlu0 %1399, %v765_v27  }
  0x6e   :  { %1054 = vperm.xlu1 %1400, %v768_v28   ;;  %1049 = vperm.xlu0 %1399, %v767_v29  }
  0x72   :  { %1064 = vperm.xlu1 %1400, %v770_v30   ;;  %1059 = vperm.xlu0 %1399, %v769_v31  }
  0x76   :  { %1074 = vperm.xlu1 %1400, %v772_v32   ;;  %1069 = vperm.xlu0 %1399, %v771_v33  }
  0x7a   :  { %1084 = vperm.xlu1 %1400, %v774_v34   ;;  %1079 = vperm.xlu0 %1399, %v773_v35  }
  0x7e   :  { %1094 = vperm.xlu1 %1400, %v776_v36   ;;  %1089 = vperm.xlu0 %1399, %v775_v37  }
  0x81   :  { %v1784_v38 = vpop.permute.xlu1 %789  ;;  %v1786_v39 = vpop.permute.xlu0 %779 }
  0x85   :  { %v1788_v40 = vpop.permute.xlu1 %794  ;;  %v1790_v41 = vpop.permute.xlu0 %784 }
  0x89   :  { %v1792_v42 = vpop.permute.xlu1 %804  ;;  %v1794_v43 = vpop.permute.xlu0 %799 }
  0x8d   :  { %v1796_v44 = vpop.permute.xlu1 %814  ;;  %v1798_v45 = vpop.permute.xlu0 %809 }
  0x91   :  { %v1800_v46 = vpop.permute.xlu1 %824  ;;  %v1802_v47 = vpop.permute.xlu0 %819 }
  0x95   :  { %v1804_v48 = vpop.permute.xlu1 %834  ;;  %v1806_v49 = vpop.permute.xlu0 %829 }
  0x99   :  { %v1808_v50 = vpop.permute.xlu1 %844  ;;  %v1810_v51 = vpop.permute.xlu0 %839 }
  0x9d   :  { %v1812_v52 = vpop.permute.xlu1 %854  ;;  %v1814_v53 = vpop.permute.xlu0 %849 }
  0xa1   :  { %v1816_v54 = vpop.permute.xlu1 %864  ;;  %v1818_v55 = vpop.permute.xlu0 %859 }
  0xa5   :  { %v1820_v56 = vpop.permute.xlu1 %874  ;;  %v1822_v57 = vpop.permute.xlu0 %869 }
  0xa9   :  { %v1824_v58 = vpop.permute.xlu1 %884  ;;  %v1826_v59 = vpop.permute.xlu0 %879 }
  0xad   :  { %v1828_v60 = vpop.permute.xlu1 %894  ;;  %v1830_v61 = vpop.permute.xlu0 %889 }
  0xb1   :  { %v1832_v62 = vpop.permute.xlu1 %904  ;;  %v1834_v63 = vpop.permute.xlu0 %899 }
  0xb2   :  { %2276 = vst [vmem:[#allocation2_spill] sm:$0xff] %v1832_v62 }
  0xb5   :  { %v1836_v0 = vpop.permute.xlu1 %914  ;;  %v1838_v1 = vpop.permute.xlu0 %909 }
  0xb6   :  { %2277 = vst [vmem:[#allocation3_spill] sm:$0xff] %v1836_v0 }
  0xb9   :  { %v1840_v2 = vpop.permute.xlu1 %924  ;;  %v1842_v3 = vpop.permute.xlu0 %919 }
  0xba   :  { %2278 = vst [vmem:[#allocation4_spill] sm:$0xff] %v1840_v2  ;;  %2279 = vst [vmem:[#allocation5_spill] sm:$0xff] %v1842_v3 }
  0xbd   :  { %v1844_v4 = vpop.permute.xlu1 %934  ;;  %v1846_v5 = vpop.permute.xlu0 %929 }
  0xbe   :  { %2280 = vst [vmem:[#allocation6_spill] sm:$0xff] %v1844_v4  ;;  %2281 = vst [vmem:[#allocation7_spill] sm:$0xff] %v1846_v5 }
  0xc1   :  { %v945_v6 = vpop.permute.xlu1 %944  ;;  %v940_v7 = vpop.permute.xlu0 %939 }
  0xc5   :  { %v955_v8 = vpop.permute.xlu1 %954  ;;  %v950_v9 = vpop.permute.xlu0 %949 }
  0xc9   :  { %v1848_v10 = vpop.permute.xlu1 %964  ;;  %v1850_v11 = vpop.permute.xlu0 %959 }
  0xcd   :  { %v1852_v12 = vpop.permute.xlu1 %974  ;;  %v1854_v13 = vpop.permute.xlu0 %969 }
  0xd1   :  { %v1856_v14 = vpop.permute.xlu1 %984  ;;  %v1858_v15 = vpop.permute.xlu0 %979 }
  0xd5   :  { %v1860_v16 = vpop.permute.xlu1 %994  ;;  %v1862_v17 = vpop.permute.xlu0 %989 }
  0xd9   :  { %v1864_v18 = vpop.permute.xlu1 %1004  ;;  %v1866_v19 = vpop.permute.xlu0 %999 }
  0xdd   :  { %v1873_v21 = vpop.permute.xlu1 %1014  ;;  %v1875_v22 = vpop.permute.xlu0 %1009 }
  0xde   :  { %v1333_v23 = vpop.f32.mrb[0].mxu0  ;;  %v1365_v24 = vpop.f32.mrb[0].mxu1 }
  0xdf   :  { %v403_v25 = vadd.f32 %v1333_v23, %v1871_v20  ;;  %v531_v26 = vadd.f32 %v1365_v24, %v1871_v20  ;;  %v394_v27 = vpop.f32.mrb[1].mxu0  ;;  %v522_v28 = vpop.f32.mrb[1].mxu1 }
  0xe0   :  { %v395_v29 = vadd.f32 %v1871_v20, %v394_v27  ;;  %v523_v30 = vadd.f32 %v1871_v20, %v522_v28  ;;  %v1334_v31 = vpop.f32.mrb[2].mxu0  ;;  %v1366_v32 = vpop.f32.mrb[2].mxu1 }
  0xe1   :  { %v651_v33 = vmax.f32 %v403_v25, 0.0  ;;  %v683_v34 = vmax.f32 %v531_v26, 0.0  ;;  %v406_v35 = vadd.f32 %v1334_v31, %v1871_v20  ;;  %v534_v36 = vadd.f32 %v1366_v32, %v1871_v20  ;;  %v397_v37 = vpop.f32.mrb[3].mxu0  ;;  %v525_v2 = vpop.f32.mrb[3].mxu1 }
  0xe2   :  { %v649_v23 = vmax.f32 %v395_v29, 0.0  ;;  %v681_v4 = vmax.f32 %v523_v30, 0.0  ;;  %v398_v24 = vadd.f32 %v1871_v20, %v397_v37  ;;  %v526_v3 = vadd.f32 %v1871_v20, %v525_v2 }
  0xe3   :  { %v1099_v27 = vadd.f32 %v1784_v38, %v651_v33  ;;  %v1131_v5 = vadd.f32 %v950_v9, %v683_v34  ;;  %v652_v28 = vmax.f32 %v406_v35, 0.0  ;;  %v684_v62 = vmax.f32 %v534_v36, 0.0 }
  0xe4   :  { %v1097_v25 = vadd.f32 %v1786_v39, %v649_v23  ;;  %v1129_v26 = vadd.f32 %v940_v7, %v681_v4  ;;  %v650_v0 = vmax.f32 %v398_v24, 0.0  ;;  %v682_v31 = vmax.f32 %v526_v3, 0.0  ;;  %v1905_v4 = vpop.permute.xlu1 %1024  ;;  %v1907_v7 = vpop.permute.xlu0 %1019 }
  0xe5   :  { %1164 = vst.msk [vmem:[%s2275_s4 + $0x10] sm:$0xff] %vm1161_vm3, %v1099_v27  ;;  %1196 = vst.msk [vmem:[%s2275_s4 + $0x110] sm:$0xff] %vm1161_vm3, %v1131_v5  ;;  %v1100_v38 = vadd.f32 %v1788_v40, %v652_v28  ;;  %v1132_v2 = vadd.f32 %v955_v8, %v684_v62 }
  0xe6   :  { %1162 = vst.msk [vmem:[%s2275_s4] sm:$0xff] %vm1161_vm3, %v1097_v25  ;;  %1194 = vst.msk [vmem:[%s2275_s4 + $0x100] sm:$0xff] %vm1161_vm3, %v1129_v26  ;;  %v1098_v39 = vadd.f32 %v1790_v41, %v650_v0  ;;  %v1130_v3 = vadd.f32 %v945_v6, %v682_v31  ;;  %v1337_v40 = vpop.f32.mrb[4].mxu0  ;;  %v1369_v62 = vpop.f32.mrb[4].mxu1 }
  0xe7   :  { %1165 = vst.msk [vmem:[%s2275_s4 + $0x18] sm:$0xff] %vm1161_vm3, %v1100_v38  ;;  %1197 = vst.msk [vmem:[%s2275_s4 + $0x118] sm:$0xff] %vm1161_vm3, %v1132_v2  ;;  %v419_v41 = vadd.f32 %v1337_v40, %v1871_v20  ;;  %v547_v0 = vadd.f32 %v1369_v62, %v1871_v20  ;;  %v410_v5 = vpop.f32.mrb[5].mxu0  ;;  %v538_v6 = vpop.f32.mrb[5].mxu1 }
  0xe8   :  { %1163 = vst.msk [vmem:[%s2275_s4 + $0x8] sm:$0xff] %vm1161_vm3, %v1098_v39  ;;  %1195 = vst.msk [vmem:[%s2275_s4 + $0x108] sm:$0xff] %vm1161_vm3, %v1130_v3  ;;  %v411_v8 = vadd.f32 %v1871_v20, %v410_v5  ;;  %v539_v9 = vadd.f32 %v1871_v20, %v538_v6  ;;  %v1338_v29 = vpop.f32.mrb[6].mxu0  ;;  %v1370_v30 = vpop.f32.mrb[6].mxu1 }
  0xe9   :  { %v655_v32 = vmax.f32 %v419_v41, 0.0  ;;  %v687_v33 = vmax.f32 %v547_v0, 0.0  ;;  %v422_v34 = vadd.f32 %v1338_v29, %v1871_v20  ;;  %v550_v35 = vadd.f32 %v1370_v30, %v1871_v20  ;;  %v413_v36 = vpop.f32.mrb[7].mxu0  ;;  %v541_v37 = vpop.f32.mrb[7].mxu1 }
  0xea   :  { %v653_v23 = vmax.f32 %v411_v8, 0.0  ;;  %v685_v24 = vmax.f32 %v539_v9, 0.0  ;;  %v414_v27 = vadd.f32 %v1871_v20, %v413_v36  ;;  %v542_v28 = vadd.f32 %v1871_v20, %v541_v37  ;;  %v1947_v41 = vpop.permute.xlu1 %1034 }
  0xeb   :  { %v1103_v25 = vadd.f32 %v1798_v45, %v655_v32  ;;  %v1135_v26 = vadd.f32 %v1854_v13, %v687_v33  ;;  %v656_v31 = vmax.f32 %v422_v34, 0.0  ;;  %v688_v38 = vmax.f32 %v550_v35, 0.0 }
  0xec   :  { %v1101_v2 = vadd.f32 %v1794_v43, %v653_v23  ;;  %v1133_v39 = vadd.f32 %v1850_v11, %v685_v24  ;;  %v654_v3 = vmax.f32 %v414_v27, 0.0  ;;  %v686_v40 = vmax.f32 %v542_v28, 0.0  ;;  %v1949_v11 = vpop.permute.xlu0 %1029 }
  0xed   :  { %1168 = vst.msk [vmem:[%s2275_s4 + $0x30] sm:$0xff] %vm1161_vm3, %v1103_v25  ;;  %1200 = vst.msk [vmem:[%s2275_s4 + $0x130] sm:$0xff] %vm1161_vm3, %v1135_v26  ;;  %v1104_v45 = vadd.f32 %v1796_v44, %v656_v31  ;;  %v1136_v13 = vadd.f32 %v1852_v12, %v688_v38 }
  0xee   :  { %v1341_v62 = vpop.f32.mrb[8].mxu0  ;;  %v1373_v43 = vpop.f32.mrb[8].mxu1  ;;  %1166 = vst.msk [vmem:[%s2275_s4 + $0x20] sm:$0xff] %vm1161_vm3, %v1101_v2  ;;  %1198 = vst.msk [vmem:[%s2275_s4 + $0x120] sm:$0xff] %vm1161_vm3, %v1133_v39  ;;  %v1102_v44 = vadd.f32 %v1792_v42, %v654_v3  ;;  %v1134_v12 = vadd.f32 %v1848_v10, %v686_v40 }
  0xef   :  { %v435_v0 = vadd.f32 %v1341_v62, %v1871_v20  ;;  %v563_v5 = vadd.f32 %v1373_v43, %v1871_v20  ;;  %1169 = vst.msk [vmem:[%s2275_s4 + $0x38] sm:$0xff] %vm1161_vm3, %v1104_v45  ;;  %1201 = vst.msk [vmem:[%s2275_s4 + $0x138] sm:$0xff] %vm1161_vm3, %v1136_v13  ;;  %v426_v6 = vpop.f32.mrb[9].mxu0  ;;  %v554_v8 = vpop.f32.mrb[9].mxu1 }
  0xf0   :  { %1167 = vst.msk [vmem:[%s2275_s4 + $0x28] sm:$0xff] %vm1161_vm3, %v1102_v44  ;;  %1199 = vst.msk [vmem:[%s2275_s4 + $0x128] sm:$0xff] %vm1161_vm3, %v1134_v12  ;;  %v427_v9 = vadd.f32 %v1871_v20, %v426_v6  ;;  %v555_v29 = vadd.f32 %v1871_v20, %v554_v8  ;;  %v1342_v30 = vpop.f32.mrb[10].mxu0  ;;  %v1374_v32 = vpop.f32.mrb[10].mxu1 }
  0xf1   :  { %v659_v42 = vmax.f32 %v435_v0, 0.0  ;;  %v691_v10 = vmax.f32 %v563_v5, 0.0  ;;  %v438_v33 = vadd.f32 %v1342_v30, %v1871_v20  ;;  %v566_v34 = vadd.f32 %v1374_v32, %v1871_v20  ;;  %v429_v35 = vpop.f32.mrb[11].mxu0  ;;  %v557_v36 = vpop.f32.mrb[11].mxu1 }
  0xf2   :  { %v657_v24 = vmax.f32 %v427_v9, 0.0  ;;  %v689_v27 = vmax.f32 %v555_v29, 0.0  ;;  %v430_v26 = vadd.f32 %v1871_v20, %v429_v35  ;;  %v558_v31 = vadd.f32 %v1871_v20, %v557_v36  ;;  %v1999_v13 = vpop.permute.xlu1 %1044  ;;  %v2001_v62 = vpop.permute.xlu0 %1039 }
  0xf3   :  { %v1107_v37 = vadd.f32 %v1806_v49, %v659_v42  ;;  %v1139_v23 = vadd.f32 %v1862_v17, %v691_v10  ;;  %v660_v28 = vmax.f32 %v438_v33, 0.0  ;;  %v692_v25 = vmax.f32 %v566_v34, 0.0 }
  0xf4   :  { %v1105_v49 = vadd.f32 %v1802_v47, %v657_v24  ;;  %v1137_v17 = vadd.f32 %v1858_v15, %v689_v27  ;;  %v658_v39 = vmax.f32 %v430_v26, 0.0  ;;  %v690_v3 = vmax.f32 %v558_v31, 0.0 }
  0xf5   :  { %1172 = vst.msk [vmem:[%s2275_s4 + $0x50] sm:$0xff] %vm1161_vm3, %v1107_v37  ;;  %1204 = vst.msk [vmem:[%s2275_s4 + $0x150] sm:$0xff] %vm1161_vm3, %v1139_v23  ;;  %v1108_v38 = vadd.f32 %v1804_v48, %v660_v28  ;;  %v1140_v2 = vadd.f32 %v1860_v16, %v692_v25 }
  0xf6   :  { %v1345_v40 = vpop.f32.mrb[12].mxu0  ;;  %v1377_v45 = vpop.f32.mrb[12].mxu1  ;;  %1170 = vst.msk [vmem:[%s2275_s4 + $0x40] sm:$0xff] %vm1161_vm3, %v1105_v49  ;;  %1202 = vst.msk [vmem:[%s2275_s4 + $0x140] sm:$0xff] %vm1161_vm3, %v1137_v17  ;;  %v1106_v15 = vadd.f32 %v1800_v46, %v658_v39  ;;  %v1138_v16 = vadd.f32 %v1856_v14, %v690_v3 }
  0xf7   :  { %v451_v47 = vadd.f32 %v1345_v40, %v1871_v20  ;;  %v579_v48 = vadd.f32 %v1377_v45, %v1871_v20  ;;  %1173 = vst.msk [vmem:[%s2275_s4 + $0x58] sm:$0xff] %vm1161_vm3, %v1108_v38  ;;  %1205 = vst.msk [vmem:[%s2275_s4 + $0x158] sm:$0xff] %vm1161_vm3, %v1140_v2  ;;  %v442_v43 = vpop.f32.mrb[13].mxu0  ;;  %v570_v44 = vpop.f32.mrb[13].mxu1 }
  0xf8   :  { %v443_v5 = vadd.f32 %v1871_v20, %v442_v43  ;;  %v571_v6 = vadd.f32 %v1871_v20, %v570_v44  ;;  %v1346_v8 = vpop.f32.mrb[14].mxu0  ;;  %v1378_v42 = vpop.f32.mrb[14].mxu1  ;;  %1171 = vst.msk [vmem:[%s2275_s4 + $0x48] sm:$0xff] %vm1161_vm3, %v1106_v15  ;;  %1203 = vst.msk [vmem:[%s2275_s4 + $0x148] sm:$0xff] %vm1161_vm3, %v1138_v16 }
  0xf9   :  { %v663_v12 = vmax.f32 %v451_v47, 0.0  ;;  %v695_v0 = vmax.f32 %v579_v48, 0.0  ;;  %v454_v46 = vadd.f32 %v1346_v8, %v1871_v20  ;;  %v582_v14 = vadd.f32 %v1378_v42, %v1871_v20  ;;  %v445_v10 = vpop.f32.mrb[15].mxu0  ;;  %v573_v9 = vpop.f32.mrb[15].mxu1 }
  0xfa   :  { %v661_v32 = vmax.f32 %v443_v5, 0.0  ;;  %v693_v33 = vmax.f32 %v571_v6, 0.0  ;;  %v446_v36 = vadd.f32 %v1871_v20, %v445_v10  ;;  %v574_v37 = vadd.f32 %v1871_v20, %v573_v9  ;;  %v2051_v31 = vpop.permute.xlu1 %1054  ;;  %v2053_v49 = vpop.permute.xlu0 %1049 }
  0xfb   :  { %v1111_v29 = vadd.f32 %v1814_v53, %v663_v12  ;;  %v1143_v30 = vadd.f32 %v1875_v22, %v695_v0  ;;  %v664_v34 = vmax.f32 %v454_v46, 0.0  ;;  %v696_v35 = vmax.f32 %v582_v14, 0.0 }
  0xfc   :  { %v1109_v53 = vadd.f32 %v1810_v51, %v661_v32  ;;  %v1141_v22 = vadd.f32 %v1866_v19, %v693_v33  ;;  %v662_v27 = vmax.f32 %v446_v36, 0.0  ;;  %v694_v28 = vmax.f32 %v574_v37, 0.0 }
  0xfd   :  { %1176 = vst.msk [vmem:[%s2275_s4 + $0x70] sm:$0xff] %vm1161_vm3, %v1111_v29  ;;  %1208 = vst.msk [vmem:[%s2275_s4 + $0x170] sm:$0xff] %vm1161_vm3, %v1143_v30  ;;  %v1112_v23 = vadd.f32 %v1812_v52, %v664_v34  ;;  %v1144_v24 = vadd.f32 %v1873_v21, %v696_v35 }
  0xfe   :  { %v1349_v25 = vpop.f32.mrb[16].mxu0  ;;  %v1381_v26 = vpop.f32.mrb[16].mxu1  ;;  %1174 = vst.msk [vmem:[%s2275_s4 + $0x60] sm:$0xff] %vm1161_vm3, %v1109_v53  ;;  %1206 = vst.msk [vmem:[%s2275_s4 + $0x160] sm:$0xff] %vm1161_vm3, %v1141_v22  ;;  %v1110_v19 = vadd.f32 %v1808_v50, %v662_v27  ;;  %v1142_v21 = vadd.f32 %v1864_v18, %v694_v28 }
  0xff   :  { %v467_v51 = vadd.f32 %v1349_v25, %v1871_v20  ;;  %v595_v52 = vadd.f32 %v1381_v26, %v1871_v20  ;;  %1177 = vst.msk [vmem:[%s2275_s4 + $0x78] sm:$0xff] %vm1161_vm3, %v1112_v23  ;;  %1209 = vst.msk [vmem:[%s2275_s4 + $0x178] sm:$0xff] %vm1161_vm3, %v1144_v24  ;;  %v458_v17 = vpop.f32.mrb[17].mxu0  ;;  %v586_v38 = vpop.f32.mrb[17].mxu1 }
 0x100   :  { %v459_v3 = vadd.f32 %v1871_v20, %v458_v17  ;;  %v587_v40 = vadd.f32 %v1871_v20, %v586_v38  ;;  %v1350_v45 = vpop.f32.mrb[18].mxu0  ;;  %v1382_v47 = vpop.f32.mrb[18].mxu1  ;;  %1175 = vst.msk [vmem:[%s2275_s4 + $0x68] sm:$0xff] %vm1161_vm3, %v1110_v19  ;;  %1207 = vst.msk [vmem:[%s2275_s4 + $0x168] sm:$0xff] %vm1161_vm3, %v1142_v21 }
 0x101   :  { %v667_v2 = vmax.f32 %v467_v51, 0.0  ;;  %v699_v39 = vmax.f32 %v595_v52, 0.0  ;;  %v470_v50 = vadd.f32 %v1350_v45, %v1871_v20  ;;  %v598_v18 = vadd.f32 %v1382_v47, %v1871_v20  ;;  %v461_v48 = vpop.f32.mrb[19].mxu0  ;;  %v589_v15 = vpop.f32.mrb[19].mxu1 }
 0x102   :  { %v665_v44 = vmax.f32 %v459_v3, 0.0  ;;  %v697_v12 = vmax.f32 %v587_v40, 0.0  ;;  %v462_v6 = vadd.f32 %v1871_v20, %v461_v48  ;;  %v590_v8 = vadd.f32 %v1871_v20, %v589_v15  ;;  %v2091_v42 = vpop.permute.xlu1 %1064  ;;  %v2093_v46 = vpop.permute.xlu0 %1059 }
 0x103   :  { %v1115_v16 = vadd.f32 %v1822_v57, %v667_v2  ;;  %v1147_v43 = vadd.f32 %v1949_v11, %v699_v39  ;;  %v668_v0 = vmax.f32 %v470_v50, 0.0  ;;  %v700_v5 = vmax.f32 %v598_v18, 0.0 }
 0x104   :  { %v1113_v57 = vadd.f32 %v1818_v55, %v665_v44  ;;  %v1145_v11 = vadd.f32 %v1907_v7, %v697_v12  ;;  %v666_v9 = vmax.f32 %v462_v6, 0.0  ;;  %v698_v29 = vmax.f32 %v590_v8, 0.0 }
 0x105   :  { %1180 = vst.msk [vmem:[%s2275_s4 + $0x90] sm:$0xff] %vm1161_vm3, %v1115_v16  ;;  %1212 = vst.msk [vmem:[%s2275_s4 + $0x190] sm:$0xff] %vm1161_vm3, %v1147_v43  ;;  %v1116_v14 = vadd.f32 %v1820_v56, %v668_v0  ;;  %v1148_v10 = vadd.f32 %v1947_v41, %v700_v5 }
 0x106   :  { %v1353_v30 = vpop.f32.mrb[20].mxu0  ;;  %v1385_v32 = vpop.f32.mrb[20].mxu1  ;;  %1178 = vst.msk [vmem:[%s2275_s4 + $0x80] sm:$0xff] %vm1161_vm3, %v1113_v57  ;;  %1210 = vst.msk [vmem:[%s2275_s4 + $0x180] sm:$0xff] %vm1161_vm3, %v1145_v11  ;;  %v1114_v33 = vadd.f32 %v1816_v54, %v666_v9  ;;  %v1146_v34 = vadd.f32 %v1905_v4, %v698_v29 }
 0x107   :  { %v483_v55 = vadd.f32 %v1353_v30, %v1871_v20  ;;  %v611_v56 = vadd.f32 %v1385_v32, %v1871_v20  ;;  %v474_v7 = vpop.f32.mrb[21].mxu0  ;;  %v602_v41 = vpop.f32.mrb[21].mxu1  ;;  %1181 = vst.msk [vmem:[%s2275_s4 + $0x98] sm:$0xff] %vm1161_vm3, %v1116_v14  ;;  %1213 = vst.msk [vmem:[%s2275_s4 + $0x198] sm:$0xff] %vm1161_vm3, %v1148_v10 }
 0x108   :  { %v475_v35 = vadd.f32 %v1871_v20, %v474_v7  ;;  %v603_v36 = vadd.f32 %v1871_v20, %v602_v41  ;;  %v1354_v37 = vpop.f32.mrb[22].mxu0  ;;  %v1386_v53 = vpop.f32.mrb[22].mxu1  ;;  %1179 = vst.msk [vmem:[%s2275_s4 + $0x88] sm:$0xff] %vm1161_vm3, %v1114_v33  ;;  %1211 = vst.msk [vmem:[%s2275_s4 + $0x188] sm:$0xff] %vm1161_vm3, %v1146_v34 }
 0x109   :  { %v671_v22 = vmax.f32 %v483_v55, 0.0  ;;  %v703_v23 = vmax.f32 %v611_v56, 0.0  ;;  %v486_v24 = vadd.f32 %v1354_v37, %v1871_v20  ;;  %v614_v27 = vadd.f32 %v1386_v53, %v1871_v20  ;;  %v477_v28 = vpop.f32.mrb[23].mxu0  ;;  %v605_v25 = vpop.f32.mrb[23].mxu1 }
 0x10a   :  { %v669_v54 = vmax.f32 %v475_v35, 0.0  ;;  %v701_v4 = vmax.f32 %v603_v36, 0.0  ;;  %v478_v26 = vadd.f32 %v1871_v20, %v477_v28  ;;  %v606_v51 = vadd.f32 %v1871_v20, %v605_v25  ;;  %v1075_v40 = vpop.permute.xlu1 %1074  ;;  %v1070_v45 = vpop.permute.xlu0 %1069 }
 0x10b   :  { %v1119_v52 = vadd.f32 %v1830_v61, %v671_v22  ;;  %v1151_v19 = vadd.f32 %v2053_v49, %v703_v23  ;;  %v672_v21 = vmax.f32 %v486_v24, 0.0  ;;  %v704_v17 = vmax.f32 %v614_v27, 0.0 }
 0x10c   :  { %v1117_v38 = vadd.f32 %v1826_v59, %v669_v54  ;;  %v1149_v2 = vadd.f32 %v2001_v62, %v701_v4  ;;  %v670_v39 = vmax.f32 %v478_v26, 0.0  ;;  %v702_v3 = vmax.f32 %v606_v51, 0.0 }
 0x10d   :  { %1184 = vst.msk [vmem:[%s2275_s4 + $0xb0] sm:$0xff] %vm1161_vm3, %v1119_v52  ;;  %1216 = vst.msk [vmem:[%s2275_s4 + $0x1b0] sm:$0xff] %vm1161_vm3, %v1151_v19  ;;  %v1120_v61 = vadd.f32 %v1828_v60, %v672_v21  ;;  %v1152_v59 = vadd.f32 %v2051_v31, %v704_v17 }
 0x10e   :  { %1182 = vst.msk [vmem:[%s2275_s4 + $0xa0] sm:$0xff] %vm1161_vm3, %v1117_v38  ;;  %1214 = vst.msk [vmem:[%s2275_s4 + $0x1a0] sm:$0xff] %vm1161_vm3, %v1149_v2  ;;  %v1118_v62 = vadd.f32 %v1824_v58, %v670_v39  ;;  %v1150_v49 = vadd.f32 %v1999_v13, %v702_v3  ;;  %v1357_v47 = vpop.f32.mrb[24].mxu0  ;;  %v1389_v50 = vpop.f32.mrb[24].mxu1 }
 0x10f   :  { %1185 = vst.msk [vmem:[%s2275_s4 + $0xb8] sm:$0xff] %vm1161_vm3, %v1120_v61  ;;  %1217 = vst.msk [vmem:[%s2275_s4 + $0x1b8] sm:$0xff] %vm1161_vm3, %v1152_v59  ;;  %v499_v60 = vadd.f32 %v1357_v47, %v1871_v20  ;;  %v627_v31 = vadd.f32 %v1389_v50, %v1871_v20  ;;  %v490_v18 = vpop.f32.mrb[25].mxu0  ;;  %v618_v58 = vpop.f32.mrb[25].mxu1  ;;  %v2285_v47 = vld [vmem:[#allocation5_spill] sm:$0xff] }
 0x110   :  { %1183 = vst.msk [vmem:[%s2275_s4 + $0xa8] sm:$0xff] %vm1161_vm3, %v1118_v62  ;;  %1215 = vst.msk [vmem:[%s2275_s4 + $0x1a8] sm:$0xff] %vm1161_vm3, %v1150_v49  ;;  %v491_v13 = vadd.f32 %v1871_v20, %v490_v18  ;;  %v619_v48 = vadd.f32 %v1871_v20, %v618_v58  ;;  %v1358_v15 = vpop.f32.mrb[26].mxu0  ;;  %v1390_v16 = vpop.f32.mrb[26].mxu1 }
 0x111   :  { %v675_v43 = vmax.f32 %v499_v60, 0.0  ;;  %v707_v44 = vmax.f32 %v627_v31, 0.0  ;;  %v502_v12 = vadd.f32 %v1358_v15, %v1871_v20  ;;  %v630_v0 = vadd.f32 %v1390_v16, %v1871_v20  ;;  %v493_v5 = vpop.f32.mrb[27].mxu0  ;;  %v621_v6 = vpop.f32.mrb[27].mxu1 }
 0x112   :  { %v673_v8 = vmax.f32 %v491_v13, 0.0  ;;  %v705_v57 = vmax.f32 %v619_v48, 0.0  ;;  %v494_v11 = vadd.f32 %v1871_v20, %v493_v5  ;;  %v622_v14 = vadd.f32 %v1871_v20, %v621_v6  ;;  %v1080_v32 = vpop.permute.xlu0 %1079  ;;  %v1085_v33 = vpop.permute.xlu1 %1084  ;;  %v2287_v48 = vld [vmem:[#allocation4_spill] sm:$0xff] }
 0x113   :  { %v1123_v10 = vadd.f32 %v1838_v1, %v675_v43  ;;  %v1155_v9 = vadd.f32 %v1070_v45, %v707_v44  ;;  %v676_v29 = vmax.f32 %v502_v12, 0.0  ;;  %v708_v30 = vmax.f32 %v630_v0, 0.0  ;;  %v2282_v1 = vld [vmem:[#allocation3_spill] sm:$0xff] }
 0x114   :  { %v1121_v55 = vadd.f32 %v1834_v63, %v673_v8  ;;  %v1153_v56 = vadd.f32 %v2093_v46, %v705_v57  ;;  %v674_v7 = vmax.f32 %v494_v11, 0.0  ;;  %v706_v41 = vmax.f32 %v622_v14, 0.0  ;;  %v2283_v63 = vld [vmem:[#allocation2_spill] sm:$0xff] }
 0x115   :  { %1188 = vst.msk [vmem:[%s2275_s4 + $0xd0] sm:$0xff] %vm1161_vm3, %v1123_v10  ;;  %1220 = vst.msk [vmem:[%s2275_s4 + $0x1d0] sm:$0xff] %vm1161_vm3, %v1155_v9  ;;  %v1124_v34 = vadd.f32 %v2282_v1, %v676_v29  ;;  %v1156_v35 = vadd.f32 %v1075_v40, %v708_v30  ;;  %v2284_v40 = vld [vmem:[#allocation7_spill] sm:$0xff] }
 0x116   :  { %1186 = vst.msk [vmem:[%s2275_s4 + $0xc0] sm:$0xff] %vm1161_vm3, %v1121_v55  ;;  %1218 = vst.msk [vmem:[%s2275_s4 + $0x1c0] sm:$0xff] %vm1161_vm3, %v1153_v56  ;;  %v1122_v46 = vadd.f32 %v2283_v63, %v674_v7  ;;  %v1154_v36 = vadd.f32 %v2091_v42, %v706_v41  ;;  %v1361_v37 = vpop.f32.mrb[28].mxu0  ;;  %v1393_v53 = vpop.f32.mrb[28].mxu1 }
 0x117   :  { %1189 = vst.msk [vmem:[%s2275_s4 + $0xd8] sm:$0xff] %vm1161_vm3, %v1124_v34  ;;  %1221 = vst.msk [vmem:[%s2275_s4 + $0x1d8] sm:$0xff] %vm1161_vm3, %v1156_v35  ;;  %v515_v22 = vadd.f32 %v1361_v37, %v1871_v20  ;;  %v643_v23 = vadd.f32 %v1393_v53, %v1871_v20  ;;  %v506_v24 = vpop.f32.mrb[29].mxu0  ;;  %v634_v27 = vpop.f32.mrb[29].mxu1 }
 0x118   :  { %1187 = vst.msk [vmem:[%s2275_s4 + $0xc8] sm:$0xff] %vm1161_vm3, %v1122_v46  ;;  %1219 = vst.msk [vmem:[%s2275_s4 + $0x1c8] sm:$0xff] %vm1161_vm3, %v1154_v36  ;;  %v507_v42 = vadd.f32 %v1871_v20, %v506_v24  ;;  %v635_v28 = vadd.f32 %v1871_v20, %v634_v27  ;;  %v1362_v25 = vpop.f32.mrb[30].mxu0  ;;  %v1394_v54 = vpop.f32.mrb[30].mxu1 }
 0x119   :  { %v679_v4 = vmax.f32 %v515_v22, 0.0  ;;  %v711_v26 = vmax.f32 %v643_v23, 0.0  ;;  %v518_v51 = vadd.f32 %v1362_v25, %v1871_v20  ;;  %v646_v52 = vadd.f32 %v1394_v54, %v1871_v20  ;;  %v509_v19 = vpop.f32.mrb[31].mxu0  ;;  %v637_v21 = vpop.f32.mrb[31].mxu1 }
 0x11a   :  { %v1090_v17 = vpop.permute.xlu0 %1089  ;;  %v677_v38 = vmax.f32 %v507_v42, 0.0  ;;  %v709_v2 = vmax.f32 %v635_v28, 0.0  ;;  %v510_v39 = vadd.f32 %v1871_v20, %v509_v19  ;;  %v638_v3 = vadd.f32 %v1871_v20, %v637_v21  ;;  %v1095_v49 = vpop.permute.xlu1 %1094  ;;  %v2286_v20 = vld [vmem:[#allocation6_spill] sm:$0xff] }
 0x11b   :  { %v1127_v45 = vadd.f32 %v2284_v40, %v679_v4  ;;  %v1159_v61 = vadd.f32 %v1090_v17, %v711_v26  ;;  %v680_v59 = vmax.f32 %v518_v51, 0.0  ;;  %v712_v62 = vmax.f32 %v646_v52, 0.0 }
 0x11c   :  { %v1125_v50 = vadd.f32 %v2285_v47, %v677_v38  ;;  %v1157_v60 = vadd.f32 %v1080_v32, %v709_v2  ;;  %v678_v31 = vmax.f32 %v510_v39, 0.0  ;;  %v710_v18 = vmax.f32 %v638_v3, 0.0 }
 0x11d   :  { %1192 = vst.msk [vmem:[%s2275_s4 + $0xf0] sm:$0xff] %vm1161_vm3, %v1127_v45  ;;  %1224 = vst.msk [vmem:[%s2275_s4 + $0x1f0] sm:$0xff] %vm1161_vm3, %v1159_v61  ;;  %v1128_v58 = vadd.f32 %v2286_v20, %v680_v59  ;;  %v1160_v13 = vadd.f32 %v1095_v49, %v712_v62 }
 0x11e   :  { %1190 = vst.msk [vmem:[%s2275_s4 + $0xe0] sm:$0xff] %vm1161_vm3, %v1125_v50  ;;  %1222 = vst.msk [vmem:[%s2275_s4 + $0x1e0] sm:$0xff] %vm1161_vm3, %v1157_v60  ;;  %v1126_v15 = vadd.f32 %v2287_v48, %v678_v31  ;;  %v1158_v16 = vadd.f32 %v1085_v33, %v710_v18 }
 0x11f   :  { %1193 = vst.msk [vmem:[%s2275_s4 + $0xf8] sm:$0xff] %vm1161_vm3, %v1128_v58  ;;  %1225 = vst.msk [vmem:[%s2275_s4 + $0x1f8] sm:$0xff] %vm1161_vm3, %v1160_v13 }
 0x120   :  { %1191 = vst.msk [vmem:[%s2275_s4 + $0xe8] sm:$0xff] %vm1161_vm3, %v1126_v15  ;;  %1223 = vst.msk [vmem:[%s2275_s4 + $0x1e8] sm:$0xff] %vm1161_vm3, %v1158_v16 }

</bundles_post_ra>
